<compile_context>
chip_gen: v5e
topology: v5e:2x2
jax: 0.10.0
libtpu: 0.0.40
codegen_flags: <defaults>
</compile_context>

<pallas_src>
import numpy as np
import jax
import jax.numpy as jnp
from jax.experimental import pallas as pl
from jax.experimental.pallas import tpu as pltpu

# Small, runnable hyper-parameters consistent with the module's semantics
# (the PyTorch defaults of 800/200/800 scale identically: hop | filter_length).
FILTER_LENGTH = 64
HOP_LENGTH = 16
WIN_LENGTH = 64
CUTOFF = FILTER_LENGTH // 2 + 1            # 33
CUT_PAD = ((CUTOFF + 7) // 8) * 8          # 40 (sublane-aligned half)
R_CHUNKS = FILTER_LENGTH // HOP_LENGTH     # 4


def _round_up(x, m):
    return ((x + m - 1) // m) * m


def _window_and_basis():
    """(2*cutoff, N) windowed Fourier basis, identical to the PyTorch __init__."""
    N = FILTER_LENGTH
    fourier_basis = np.fft.fft(np.eye(N))
    fb = np.vstack(
        [np.real(fourier_basis[:CUTOFF, :]), np.imag(fourier_basis[:CUTOFF, :])]
    )  # (2*cutoff, N)
    # scipy.signal.get_window('hann', win_length, fftbins=True) == periodic Hann.
    n = np.arange(WIN_LENGTH)
    win = 0.5 - 0.5 * np.cos(2.0 * np.pi * n / WIN_LENGTH)
    # pad_center is a no-op since win_length == filter_length here.
    return fb * win[None, :]


def make_fused_chunk_basis():
    """Fused real+imag basis, sublane-padded and split into hop-sized tap chunks.

    Returns (R, 2*CUT_PAD, HOP): rows [0, cutoff) hold the real basis, rows
    [CUT_PAD, CUT_PAD + cutoff) the imaginary basis, zeros elsewhere; the tap
    axis is split into R = filter/hop chunks for the in-kernel strided-conv
    decomposition.
    """
    fb = _window_and_basis()
    fused = np.zeros((2 * CUT_PAD, FILTER_LENGTH), np.float32)
    fused[:CUTOFF, :] = fb[:CUTOFF, :]
    fused[CUT_PAD:CUT_PAD + CUTOFF, :] = fb[CUTOFF:, :]
    chunked = fused.reshape(2 * CUT_PAD, R_CHUNKS, HOP_LENGTH)
    return jnp.asarray(np.transpose(chunked, (1, 0, 2)), jnp.float32)


def stft_kernel(c_ref, basis_ref, out_ref):
    """c_ref:    (HOP, n_chunks_pad)  hop-chunked, transposed signal (one batch)
       basis_ref:(R, 2*CUT_PAD, HOP)  fused real/imag basis, chunked along taps
       out_ref:  (CUT_PAD, T)         magnitudes for frames [j*T, (j+1)*T)."""
    cut_pad, T = out_ref.shape
    n_r = basis_ref.shape[0]

    t0 = pl.multiple_of(pl.program_id(1) * T, 128)
    # One aligned slab read covering the T frames plus the extra (R-1) chunk
    # columns needed by the overlapping analysis windows.
    slab = c_ref[:, pl.ds(t0, T + 128)]                     # (HOP, T+128)

    acc = jnp.zeros((2 * cut_pad, T), jnp.float32)
    for r in range(n_r):  # strided conv == R accumulating hop-chunk matmuls
        acc = acc + jnp.dot(
            basis_ref[r], slab[:, r:r + T], preferred_element_type=jnp.float32
        )

    real = acc[:cut_pad]
    imag = acc[cut_pad:]
    out_ref[...] = jnp.sqrt(real * real + imag * imag)
    # TODO(synk): phase (atan2) is computed in the PyTorch transform() but is
    # not returned by forward(); it is intentionally omitted from the kernel.


def stft_magnitude(x, frame_tile=None):
    """x: (B, num_samples) float32 -> magnitude (B, cutoff, n_frames) float32."""
    B, num_samples = x.shape
    pad = FILTER_LENGTH // 2
    n_frames = num_samples // HOP_LENGTH + 1

    # Frames live on the lane axis: big lane-dense tile (multiple of 128).
    if frame_tile is None:
        frame_tile = max(128, min(1024, _round_up(n_frames, 128)))
    T = frame_tile
    n_tiles = -(-n_frames // T)
    n_chunks_pad = n_tiles * T + 128          # headroom for the R-1 overlap cols
    total_len = n_chunks_pad * HOP_LENGTH

    # Reflect pad (matches F.pad(..., 'reflect')), then zero-pad to a whole
    # number of hop chunks.  No im2col gather: frame extraction is in-kernel.
    xp = jnp.pad(x.astype(jnp.float32), ((0, 0), (pad, pad)), mode="reflect")
    xp = jnp.pad(xp, ((0, 0), (0, total_len - xp.shape[1])))
    # C[b, h, m] = xp[b, m*HOP + h]  -- hop-chunked, transposed signal.
    C = jnp.transpose(xp.reshape(B, n_chunks_pad, HOP_LENGTH), (0, 2, 1))

    basis = make_fused_chunk_basis()          # (R, 2*CUT_PAD, HOP)

    out = pl.pallas_call(
        stft_kernel,
        out_shape=jax.ShapeDtypeStruct((B, CUT_PAD, n_tiles * T), jnp.float32),
        grid_spec=pltpu.PrefetchScalarGridSpec(
            num_scalar_prefetch=0,
            grid=(B, n_tiles),
            in_specs=[
                # Whole per-batch chunked signal resident in VMEM (constant in j
                # => fetched once per batch, not per frame tile).
                pl.BlockSpec((None, HOP_LENGTH, n_chunks_pad),
                             lambda b, j: (b, 0, 0)),
                # Fused basis: constant block across the whole grid.
                pl.BlockSpec((R_CHUNKS, 2 * CUT_PAD, HOP_LENGTH),
                             lambda b, j: (0, 0, 0)),
            ],
            out_specs=pl.BlockSpec((None, CUT_PAD, T), lambda b, j: (b, 0, j)),
        ),
        compiler_params=pltpu.CompilerParams(
            dimension_semantics=("parallel", "parallel"),
            vmem_limit_bytes=32 * 1024 * 1024,
        ),
    )(C, basis)

    # Kernel output is already in PyTorch's (B, cutoff, n_frames) layout; just
    # strip the sublane / lane padding.
    return out[:, :CUTOFF, :n_frames]


def _reference_magnitude(x):
    """Pure-JAX reference (same math as the strided conv1d, via im2col)."""
    B, num_samples = x.shape
    pad = FILTER_LENGTH // 2
    xp = jnp.pad(x.astype(jnp.float32), ((0, 0), (pad, pad)), mode="reflect")
    n_frames = num_samples // HOP_LENGTH + 1
    idx = (
        jnp.arange(n_frames)[:, None] * HOP_LENGTH
        + jnp.arange(FILTER_LENGTH)[None, :]
    )
    frames = xp[:, idx]                                  # (B, T, N)
    fb = _window_and_basis()
    basis_r = jnp.asarray(fb[:CUTOFF].T, jnp.float32)    # (N, cutoff)
    basis_i = jnp.asarray(fb[CUTOFF:].T, jnp.float32)
    r = jnp.einsum("btn,nc->btc", frames, basis_r)
    im = jnp.einsum("btn,nc->btc", frames, basis_i)
    mag = jnp.sqrt(r * r + im * im)
    return jnp.transpose(mag, (0, 2, 1))                 # (B, cutoff, n_frames)


if __name__ == "__main__":
    key = jax.random.PRNGKey(0)
    B, num_samples = 2, 256
    x = jax.random.normal(key, (B, num_samples), dtype=jnp.float32)

    mag = jax.block_until_ready(stft_magnitude(x))
    ref = jax.block_until_ready(_reference_magnitude(x))

    assert mag.shape == (B, CUTOFF, num_samples // HOP_LENGTH + 1), mag.shape
    assert mag.dtype == jnp.float32
    np.testing.assert_allclose(np.asarray(mag), np.asarray(ref), rtol=1e-4, atol=1e-4)

    print("KERNEL_OK")
</pallas_src>

<mosaic_0001>
module attributes {stable_mosaic.version = 11 : i64} {
  func.func @stft_kernel(%arg0: i32, %arg1: i32, %arg2: memref<1x16x256xf32, #tpu.memory_space<vmem>>, %arg3: memref<4x80x16xf32, #tpu.memory_space<vmem>>, %arg4: memref<1x40x128xf32, #tpu.memory_space<vmem>>) attributes {dimension_semantics = [#tpu.dimension_semantics<parallel>, #tpu.dimension_semantics<parallel>], iteration_bounds = array<i64: 2, 1>, scalar_prefetch = 0 : i64, scratch_operands = 0 : i64, tpu.core_type = #tpu.core_type<tc>, window_params = [{transform_indices = @transform_0, window_bounds = array<i64: 1, 16, 256>}, {pipeline_mode = #tpu.pipeline_mode<synchronous>, transform_indices = @transform_1, window_bounds = array<i64: 4, 80, 16>}, {transform_indices = @transform_2, window_bounds = array<i64: 1, 40, 128>}]} {
    %c128_i32 = arith.constant 128 : i32
    %0 = arith.muli %arg1, %c128_i32 : i32
    %1 = tpu.assume_multiple %0, 128 : i32
    %c0 = arith.constant 0 : index
    %c0_0 = arith.constant 0 : index
    %2 = arith.index_cast %1 : i32 to index
    %3 = vector.load %arg2[%c0, %c0_0, %2] : memref<1x16x256xf32, #tpu.memory_space<vmem>>, vector<1x16x256xf32>
    %4 = vector.shape_cast %3 : vector<1x16x256xf32> to vector<16x256xf32>
    %cst = arith.constant 0.000000e+00 : f32
    %5 = vector.broadcast %cst : f32 to vector<80x128xf32>
    %c0_1 = arith.constant 0 : index
    %c0_2 = arith.constant 0 : index
    %c0_3 = arith.constant 0 : index
    %6 = vector.load %arg3[%c0_1, %c0_2, %c0_3] : memref<4x80x16xf32, #tpu.memory_space<vmem>>, vector<1x80x16xf32>
    %7 = vector.shape_cast %6 : vector<1x80x16xf32> to vector<80x16xf32>
    %8 = vector.extract_strided_slice %4 {offsets = [0, 0], sizes = [16, 128], strides = [1, 1]} : vector<16x256xf32> to vector<16x128xf32>
    %cst_4 = arith.constant dense<0.000000e+00> : vector<80x128xf32>
    %9 = tpu.matmul %7, %8, %cst_4 {dimension_numbers = #tpu.dot_dimension_numbers<[1], [0], [0], [1], [0, 0, 1, 1], [], []>} : vector<80x16xf32>, vector<16x128xf32>, vector<80x128xf32> -> vector<80x128xf32>
    %10 = arith.addf %5, %9 : vector<80x128xf32>
    %c1 = arith.constant 1 : index
    %c0_5 = arith.constant 0 : index
    %c0_6 = arith.constant 0 : index
    %11 = vector.load %arg3[%c1, %c0_5, %c0_6] : memref<4x80x16xf32, #tpu.memory_space<vmem>>, vector<1x80x16xf32>
    %12 = vector.shape_cast %11 : vector<1x80x16xf32> to vector<80x16xf32>
    %13 = vector.extract_strided_slice %4 {offsets = [0, 1], sizes = [16, 128], strides = [1, 1]} : vector<16x256xf32> to vector<16x128xf32>
    %cst_7 = arith.constant dense<0.000000e+00> : vector<80x128xf32>
    %14 = tpu.matmul %12, %13, %cst_7 {dimension_numbers = #tpu.dot_dimension_numbers<[1], [0], [0], [1], [0, 0, 1, 1], [], []>} : vector<80x16xf32>, vector<16x128xf32>, vector<80x128xf32> -> vector<80x128xf32>
    %15 = arith.addf %10, %14 : vector<80x128xf32>
    %c2 = arith.constant 2 : index
    %c0_8 = arith.constant 0 : index
    %c0_9 = arith.constant 0 : index
    %16 = vector.load %arg3[%c2, %c0_8, %c0_9] : memref<4x80x16xf32, #tpu.memory_space<vmem>>, vector<1x80x16xf32>
    %17 = vector.shape_cast %16 : vector<1x80x16xf32> to vector<80x16xf32>
    %18 = vector.extract_strided_slice %4 {offsets = [0, 2], sizes = [16, 128], strides = [1, 1]} : vector<16x256xf32> to vector<16x128xf32>
    %cst_10 = arith.constant dense<0.000000e+00> : vector<80x128xf32>
    %19 = tpu.matmul %17, %18, %cst_10 {dimension_numbers = #tpu.dot_dimension_numbers<[1], [0], [0], [1], [0, 0, 1, 1], [], []>} : vector<80x16xf32>, vector<16x128xf32>, vector<80x128xf32> -> vector<80x128xf32>
    %20 = arith.addf %15, %19 : vector<80x128xf32>
    %c3 = arith.constant 3 : index
    %c0_11 = arith.constant 0 : index
    %c0_12 = arith.constant 0 : index
    %21 = vector.load %arg3[%c3, %c0_11, %c0_12] : memref<4x80x16xf32, #tpu.memory_space<vmem>>, vector<1x80x16xf32>
    %22 = vector.shape_cast %21 : vector<1x80x16xf32> to vector<80x16xf32>
    %23 = vector.extract_strided_slice %4 {offsets = [0, 3], sizes = [16, 128], strides = [1, 1]} : vector<16x256xf32> to vector<16x128xf32>
    %cst_13 = arith.constant dense<0.000000e+00> : vector<80x128xf32>
    %24 = tpu.matmul %22, %23, %cst_13 {dimension_numbers = #tpu.dot_dimension_numbers<[1], [0], [0], [1], [0, 0, 1, 1], [], []>} : vector<80x16xf32>, vector<16x128xf32>, vector<80x128xf32> -> vector<80x128xf32>
    %25 = arith.addf %20, %24 : vector<80x128xf32>
    %26 = vector.extract_strided_slice %25 {offsets = [0, 0], sizes = [40, 128], strides = [1, 1]} : vector<80x128xf32> to vector<40x128xf32>
    %27 = vector.extract_strided_slice %25 {offsets = [40, 0], sizes = [40, 128], strides = [1, 1]} : vector<80x128xf32> to vector<40x128xf32>
    %28 = arith.mulf %26, %26 : vector<40x128xf32>
    %29 = arith.mulf %27, %27 : vector<40x128xf32>
    %30 = arith.addf %28, %29 : vector<40x128xf32>
    %31 = math.sqrt %30 : vector<40x128xf32>
    %c0_14 = arith.constant 0 : index
    %c0_15 = arith.constant 0 : index
    %c0_16 = arith.constant 0 : index
    %32 = vector.load %arg4[%c0_14, %c0_15, %c0_16] : memref<1x40x128xf32, #tpu.memory_space<vmem>>, vector<1x40x128xf32>
    %33 = vector.shape_cast %32 : vector<1x40x128xf32> to vector<40x128xf32>
    %34 = vector.shape_cast %31 : vector<40x128xf32> to vector<1x40x128xf32>
    tpu.vector_store %arg4[%c0_14, %c0_15, %c0_16], %34 {strides = array<i32>} : memref<1x40x128xf32, #tpu.memory_space<vmem>>, vector<1x40x128xf32>,
    return
  }
  func.func @transform_0(%arg0: i32, %arg1: i32) -> (i32, i32, i32) {
    %c0_i32 = arith.constant 0 : i32
    %c0_i32_0 = arith.constant 0 : i32
    %c0_i32_1 = arith.constant 0 : i32
    return %arg0, %c0_i32, %c0_i32_0 : i32, i32, i32
  }
  func.func @transform_1(%arg0: i32, %arg1: i32) -> (i32, i32, i32) {
    %c0_i32 = arith.constant 0 : i32
    %c0_i32_0 = arith.constant 0 : i32
    %c0_i32_1 = arith.constant 0 : i32
    %c0_i32_2 = arith.constant 0 : i32
    return %c0_i32, %c0_i32_0, %c0_i32_1 : i32, i32, i32
  }
  func.func @transform_2(%arg0: i32, %arg1: i32) -> (i32, i32, i32) {
    %c0_i32 = arith.constant 0 : i32
    %c0_i32_0 = arith.constant 0 : i32
    return %arg0, %c0_i32, %arg1 : i32, i32, i32
  }
}

</mosaic_0001>

<bundles_post_ra>
// kernel: tpu_custom_call.1
= control target key start
LH: loop header
LB: loop body
LE: loop exit
PB: predicated region body
PF: predicated region fallthrough
CT: control target
= control target key end

     0   :  { %7 = vsyncpa [#allocation3], 0  ;;  %s1335_s0 = inlined_call_operand.vmem [shape: f32[2,16,256], index: 0, kind: input, shape index: {}]   ;;  %s1336_s1 = inlined_call_operand.vmem [shape: f32[4,80,16], index: 1, kind: input, shape index: {}]   ;;  %s1337_s2 = inlined_call_operand.hbm [shape: f32[2,40,128], index: 2, kind: output, shape index: {}]  }
   0x1   :  { %9 = vsyncpa [#allocation3 + $0x1], 0  ;;  %s1034_s9 = smov 0   ;;  %s1036_s10 = smov 0  }
   0x2   :  { %s1038_s11 = smov 0   ;;  %s1040_s12 = smov 0  }
   0x3   :  { %s1042_s13 = smov 0   ;;  %s1044_s14 = smov 0  }
   0x4 LB: > { %s751_s15 = sadd.s32 4294967295, %s1012_s14   ;;  %s752_s16 = sadd.s32 4294967294, %s1012_s14   ;;  %s1012_s14 = sphi %s1044_s14, %s15_s14   ;;  %s1008_s13 = sphi %s1042_s13, %s1344_s13   ;;  %s1004_s12 = sphi %s1040_s12, %s1343_s12   ;;  %s1000_s11 = sphi %s1038_s11, %s1342_s11   ;;  %s996_s10 = sphi %s1036_s10, %s1341_s10   ;;  %s992_s9 = sphi %s1034_s9, %s1340_s9  }
   0x5   : > { %s27_s17 = sadd.s32 1, %s1008_s13  ;;  %s83_s18 = sadd.s32 1, %s1000_s11 }
   0x6   : > { %p29_p0 = scmp.ge.s32.totalorder %s27_s17, 2  ;;  %p93_p1 = scmp.ne.s32.totalorder %s1000_s11, %s996_s10 }
   0x7   : > { %p94_p2 = scmp.eq.s32.totalorder %s751_s15, 1  ;;  %p99_p3 = scmp.ne.s32.totalorder %s996_s10, %s992_s9 }
   0x8   : > { %s1346_s17 = smov (%p29_p0, %s27_s17), 0  ;;  %p100_p5 = scmp.eq.s32.totalorder %s752_s16, 1 }
   0x9   : > { %p1074_p4 = por %p94_p2, %p93_p1  ;;  %s78_s20 = ssub.s32 %s1008_s13, %s1346_s17 }
   0xa   : > { %p755_p6 = scmp.ge.s32.totalorder %s1012_s14, 1  ;;  %p81_p7 = scmp.eq.s32.totalorder %s78_s20, 0 }
   0xb   : > { %p1081_p8 = por %p100_p5, %p99_p3  ;;  %p129_p9 = scmp.lt.s32.totalorder %s1012_s14, 3 }
   0xc   : > { %s1087_s22 = scalar_select %p81_p7, %s1000_s11, %s83_s18  }
   0xd   : > { %p130_p10 = pnand %p755_p6, %p129_p9 }
   0xe   : > { %p151_p11 = scmp.lt.s32.totalorder (!%p130_p10), %s1004_s12, 1  ;;  %s1014_s28 = smov (!%p130_p10), 126  }
   0xf   : > { %133 = sbr.rel (%p130_p10) target bundleno = 391 (0x187), region = 28  ;;  %s1015_s29 = smov (!%p130_p10), 125  }
  0x10   : > { %s1016_s30 = smov (!%p130_p10), 127   ;;  %s148_s18 = sand.u32 (!%p130_p10), 1, %s996_s10  }
  0x11   : > { %s832_s20 = smul.u32 (!%p130_p10), 40, %s148_s18  ;;  %s954_s6 = scalar_lea.hbm (!%p130_p10), %s1337_s2, 80 }
  0x14   : > { %s152_s23 = scalar_select %p151_p11, %s1004_s12, 1  ;;  %vm203_vm0 = vcmask 130048   ;;  %v165_v6 = vld [vmem:[%s1336_s1] sm:$0xff]  ;;  %v166_v7 = vld [vmem:[%s1336_s1 + $0x8] sm:$0xff]  ;;  %v167_v11 = vld [vmem:[%s1336_s1 + $0x10] sm:$0xff]  ;;  %vm377_vm1 = vcmask 1031168  }
  0x15   : > { %vm488_vm2 = vcmask 1022976   ;;  %v808_v22 = vld [vmem:[%s1336_s1 + $0xf0] sm:$0xff]  ;;  %v168_v25 = vld [vmem:[%s1336_s1 + $0x18] sm:$0xff]  ;;  %vm198_vm3 = vcmask 1039360   ;;  %v788_v32 = vld [vmem:[%s1336_s1 + $0xa0] sm:$0xff] }
  0x16   : > { %s831_s24 = sshll.u32 %s152_s23, 5  ;;  %v758_v36 = vld [vmem:[%s1336_s1 + $0x50] sm:$0xff]  ;;  %v809_v37 = vld [vmem:[%s1336_s1 + $0xf8] sm:$0xff]  ;;  %v169_v38 = vld [vmem:[%s1336_s1 + $0x20] sm:$0xff]  ;;  %s1277_s23 = scalar_lea.vmem [#allocation2], %s832_s20 }
  0x17   : > { %s155_s27 = scalar_lea.vmem %s1335_s0, %s831_s24  ;;  %v789_v39 = vld [vmem:[%s1336_s1 + $0xa8] sm:$0xff]  ;;  %v759_v40 = vld [vmem:[%s1336_s1 + $0x58] sm:$0xff]  ;;  %v810_v41 = vld [vmem:[%s1336_s1 + $0x100] sm:$0xff]  ;;  %s833_s24 = smul.u32 40, %s1004_s12 }
  0x18   : > { %v163_v0 = vld [vmem:[%s155_s27 + $0x10] sm:$0xff]  ;;  %v164_v1 = vld [vmem:[%s155_s27 + $0x18] sm:$0xff]  ;;  %v161_v3 = vld [vmem:[%s155_s27] sm:$0xff] }
  0x19   : > { %v894_v2 = vpack.i.bf16 %v164_v1, %v163_v0  ;;  %v162_v4 = vld [vmem:[%s155_s27 + $0x8] sm:$0xff]  ;;  %325 = vmatpush.msra.mxu1 %v163_v0  ;;  %v790_v43 = vld [vmem:[%s1336_s1 + $0xb0] sm:$0xff]  ;;  %v760_v44 = vld [vmem:[%s1336_s1 + $0x60] sm:$0xff]  ;;  %s673_s27 = scalar_lea.hbm %s1337_s2, %s833_s24 }
  0x1a   : > { %v914_v5 = vpack.i.bf16 %v162_v4, %v161_v3  ;;  %v170_v42 = vld [vmem:[%s1336_s1 + $0x28] sm:$0xff]  ;;  %v171_v46 = vld [vmem:[%s1336_s1 + $0x30] sm:$0xff]  ;;  %v791_v47 = vld [vmem:[%s1336_s1 + $0xb8] sm:$0xff]  ;;  %s676_s12 = sshll.u32 %s673_s27, 4  ;;  %s677_s12 = int_to_ptr.hbm [resolvable:$true] %s676_s12 }
  0x1b   : > { %895 = vrot.lane.b32.xlu0 %v894_v2, %s1014_s28  ;;  %905 = vrot.lane.b32.xlu1 %v894_v2, %s1015_s29  ;;  %v811_v45 = vld [vmem:[%s1336_s1 + $0x108] sm:$0xff]  ;;  %v812_v49 = vld [vmem:[%s1336_s1 + $0x110] sm:$0xff] }
  0x1c   : > { %915 = vrot.lane.b32.xlu2 %v914_v5, %s1015_s29  ;;  %326 = vmatpush.msra.mxu1 %v161_v3  ;;  %v761_v48 = vld [vmem:[%s1336_s1 + $0x68] sm:$0xff]  ;;  %v172_v50 = vld [vmem:[%s1336_s1 + $0x38] sm:$0xff]  ;;  %v792_v51 = vld [vmem:[%s1336_s1 + $0xc0] sm:$0xff]  ;;  %s661_s29 = scalar_lea.sflag [#allocation3], %s148_s18 }
  0x1d   : > { %778 = vmatmul.msk.f32.vlgmr.msra.gmra.mxu1 %vm203_vm0, %v165_v6  ;;  %v762_v52 = vld [vmem:[%s1336_s1 + $0x70] sm:$0xff]  ;;  %v813_v53 = vld [vmem:[%s1336_s1 + $0x118] sm:$0xff]  ;;  %v173_v54 = vld [vmem:[%s1336_s1 + $0x40] sm:$0xff] }
  0x1e   : > { %v793_v55 = vld [vmem:[%s1336_s1 + $0xc8] sm:$0xff]  ;;  %v763_v56 = vld [vmem:[%s1336_s1 + $0x78] sm:$0xff]  ;;  %v814_v57 = vld [vmem:[%s1336_s1 + $0x120] sm:$0xff] }
  0x1f   : > { %v174_v58 = vld [vmem:[%s1336_s1 + $0x48] sm:$0xff]  ;;  %v794_v59 = vld [vmem:[%s1336_s1 + $0xd0] sm:$0xff]  ;;  %v764_v60 = vld [vmem:[%s1336_s1 + $0x80] sm:$0xff] }
  0x20   : > { %v815_v61 = vld [vmem:[%s1336_s1 + $0x128] sm:$0xff]  ;;  %v795_v62 = vld [vmem:[%s1336_s1 + $0xd8] sm:$0xff]  ;;  %v816_v0 = vld [vmem:[%s1336_s1 + $0x130] sm:$0xff] }
  0x21   : > { %v765_v63 = vld [vmem:[%s1336_s1 + $0x88] sm:$0xff]  ;;  %v796_v1 = vld [vmem:[%s1336_s1 + $0xe0] sm:$0xff]  ;;  %v817_v3 = vld [vmem:[%s1336_s1 + $0x138] sm:$0xff] }
  0x22   : > { %v797_v4 = vld [vmem:[%s1336_s1 + $0xe8] sm:$0xff] }
  0x23   : > { %900 = vrot.lane.b32.xlu0 %v914_v5, %s1014_s28  ;;  %910 = vrot.lane.b32.xlu1 %v894_v2, %s1016_s30  ;;  %v766_v2 = vld [vmem:[%s1336_s1 + $0x90] sm:$0xff]  ;;  %s674_s28 = sshll.u32 %s1277_s23, 4  ;;  %s675_s28 = int_to_ptr.vmem [resolvable:$true] %s674_s28 }
  0x24   : > { %920 = vrot.lane.b32.xlu2 %v914_v5, %s1016_s30  ;;  %v767_v5 = vld [vmem:[%s1336_s1 + $0x98] sm:$0xff]  ;;  %s948_s30 = sshra.s32 %s677_s12, 4  ;;  %s949_s30 = int_to_ptr.hbm [resolvable:$true] %s948_s30 }
  0x25   : > { %779 = vmatmul.msk.f32.gmra.mxu1 %vm203_vm0, %v166_v7  ;;  %s950_s3 = scalar_lea.hbm %s949_s30, 40  ;;  %p955_p1 = scmp.lt.s32.totalorder %s949_s30, %s1337_s2 }
  0x26   : > { %p951_p12 = scmp.ne.s32.totalorder %s949_s30, %s950_s3  ;;  %p956_p2 = scmp.lt.s32.totalorder %s954_s6, %s950_s3 }
  0x28   : > { %p952_p13 = pnand %p951_p12, %p1074_p4  ;;  %p957_p3 = por %p956_p2, %p955_p1 }
  0x2a   : > { %p953_p0 = pneg %p952_p13 }
  0x2c   : > { %p958_p5 = pnand %p957_p3, %p953_p0 }
  0x2d   : > { %780 = vmatmul.msk.f32.gmra.mxu1 %vm203_vm0, %v167_v11 }
  0x35   : > { %781 = vmatmul.msk.f32.gmra.mxu1 %vm203_vm0, %v168_v25 }
  0x3d   : > { %782 = vmatmul.msk.f32.gmra.mxu1 %vm203_vm0, %v169_v38 }
  0x45   : > { %783 = vmatmul.msk.f32.gmra.mxu1 %vm203_vm0, %v170_v42 }
  0x4d   : > { %784 = vmatmul.msk.f32.gmra.mxu1 %vm203_vm0, %v171_v46 }
  0x55   : > { %785 = vmatmul.msk.f32.gmra.mxu1 %vm203_vm0, %v172_v50 }
  0x5d   : > { %786 = vmatmul.msk.f32.gmra.mxu1 %vm203_vm0, %v173_v54 }
  0x65   : > { %787 = vmatmul.msk.f32.gmra.mxu1 %vm203_vm0, %v174_v58 }
  0x76   : > { %v916_v8 = vpop.permute.xlu2 %915 }
  0x77   : > { %v918_v9 = vunpack.i.h.bf16 %v916_v8  ;;  %v917_v10 = vunpack.i.l.bf16 %v916_v8 }
  0x79   : > { %v489_v20 = vsel %vm488_vm2, %v917_v10, %v918_v9 }
  0x7e   : > { %v921_v21 = vpop.permute.xlu2 %920 }
  0x7f   : > { %v923_v23 = vunpack.i.h.bf16 %v921_v21  ;;  %v922_v24 = vunpack.i.l.bf16 %v921_v21 }
  0x81   : > { %v199_v35 = vsel %vm198_vm3, %v922_v24, %v923_v23 }
  0x8d   : > { %v896_v12 = vpop.permute.xlu0 %895  ;;  %v906_v13 = vpop.permute.xlu1 %905 }
  0x8e   : > { %v898_v14 = vunpack.i.h.bf16 %v896_v12  ;;  %v897_v15 = vunpack.i.l.bf16 %v896_v12  ;;  %v908_v16 = vunpack.i.h.bf16 %v906_v13  ;;  %v907_v17 = vunpack.i.l.bf16 %v906_v13 }
  0x90   : > { %v379_v18 = vsel %vm377_vm1, %v897_v15, %v898_v14  ;;  %v490_v19 = vsel %vm488_vm2, %v907_v17, %v908_v16 }
  0x91   : > { %426 = vmatpush.msra.mxu2 %v379_v18  ;;  %537 = vmatpush.msra.mxu3 %v490_v19 }
  0x93   : > { %538 = vmatpush.msra.mxu3 %v489_v20 }
  0x94   : > { %818 = vmatmul.msk.f32.vlgmr.msra.gmra.mxu3 %vm203_vm0, %v808_v22 }
  0x95   : > { %v901_v26 = vpop.permute.xlu0 %900  ;;  %v911_v27 = vpop.permute.xlu1 %910 }
  0x96   : > { %v903_v28 = vunpack.i.h.bf16 %v901_v26  ;;  %v902_v29 = vunpack.i.l.bf16 %v901_v26  ;;  %v913_v30 = vunpack.i.h.bf16 %v911_v27  ;;  %v912_v31 = vunpack.i.l.bf16 %v911_v27 }
  0x98   : > { %v378_v33 = vsel %vm377_vm1, %v902_v29, %v903_v28  ;;  %v200_v34 = vsel %vm198_vm3, %v912_v31, %v913_v30 }
  0x99   : > { %427 = vmatpush.msra.mxu2 %v378_v33  ;;  %248 = vmatpush.msra.mxu0 %v200_v34 }
  0x9a   : > { %798 = vmatmul.msk.f32.vlgmr.msra.gmra.mxu2 %vm203_vm0, %v788_v32  ;;  %v328_v6 = vpop.f32.mrf.mxu1 }
  0x9b   : > { %249 = vmatpush.msra.mxu0 %v199_v35 }
  0x9c   : > { %768 = vmatmul.msk.f32.vlgmr.msra.gmra.mxu0 %vm203_vm0, %v758_v36  ;;  %819 = vmatmul.msk.f32.gmra.mxu3 %vm203_vm0, %v809_v37 }
  0xa2   : > { %799 = vmatmul.msk.f32.gmra.mxu2 %vm203_vm0, %v789_v39  ;;  %v331_v7 = vpop.f32.mrf.mxu1 }
  0xa4   : > { %769 = vmatmul.msk.f32.gmra.mxu0 %vm203_vm0, %v759_v40  ;;  %820 = vmatmul.msk.f32.gmra.mxu3 %vm203_vm0, %v810_v41 }
  0xaa   : > { %800 = vmatmul.msk.f32.gmra.mxu2 %vm203_vm0, %v790_v43  ;;  %v334_v10 = vpop.f32.mrf.mxu1 }
  0xac   : > { %770 = vmatmul.msk.f32.gmra.mxu0 %vm203_vm0, %v760_v44  ;;  %821 = vmatmul.msk.f32.gmra.mxu3 %vm203_vm0, %v811_v45 }
  0xb2   : > { %801 = vmatmul.msk.f32.gmra.mxu2 %vm203_vm0, %v791_v47  ;;  %v337_v14 = vpop.f32.mrf.mxu1 }
  0xb4   : > { %771 = vmatmul.msk.f32.gmra.mxu0 %vm203_vm0, %v761_v48  ;;  %822 = vmatmul.msk.f32.gmra.mxu3 %vm203_vm0, %v812_v49 }
  0xba   : > { %802 = vmatmul.msk.f32.gmra.mxu2 %vm203_vm0, %v792_v51  ;;  %v1256_v19 = vpop.f32.mrf.mxu1 }
  0xbc   : > { %772 = vmatmul.msk.f32.gmra.mxu0 %vm203_vm0, %v762_v52  ;;  %823 = vmatmul.msk.f32.gmra.mxu3 %vm203_vm0, %v813_v53 }
  0xc2   : > { %803 = vmatmul.msk.f32.gmra.mxu2 %vm203_vm0, %v793_v55  ;;  %v343_v24 = vpop.f32.mrf.mxu1 }
  0xc4   : > { %773 = vmatmul.msk.f32.gmra.mxu0 %vm203_vm0, %v763_v56  ;;  %824 = vmatmul.msk.f32.gmra.mxu3 %vm203_vm0, %v814_v57 }
  0xca   : > { %804 = vmatmul.msk.f32.gmra.mxu2 %vm203_vm0, %v794_v59  ;;  %v346_v30 = vpop.f32.mrf.mxu1 }
  0xcc   : > { %774 = vmatmul.msk.f32.gmra.mxu0 %vm203_vm0, %v764_v60  ;;  %825 = vmatmul.msk.f32.gmra.mxu3 %vm203_vm0, %v815_v61 }
  0xd2   : > { %805 = vmatmul.msk.f32.gmra.mxu2 %vm203_vm0, %v795_v62  ;;  %v349_v44 = vpop.f32.mrf.mxu1 }
  0xd4   : > { %775 = vmatmul.msk.f32.gmra.mxu0 %vm203_vm0, %v765_v63  ;;  %826 = vmatmul.msk.f32.gmra.mxu3 %vm203_vm0, %v816_v0 }
  0xda   : > { %806 = vmatmul.msk.f32.gmra.mxu2 %vm203_vm0, %v796_v1  ;;  %v352_v61 = vpop.f32.mrf.mxu1 }
  0xdc   : > { %776 = vmatmul.msk.f32.gmra.mxu0 %vm203_vm0, %v766_v2  ;;  %827 = vmatmul.msk.f32.gmra.mxu3 %vm203_vm0, %v817_v3 }
  0xe2   : > { %807 = vmatmul.msk.f32.gmra.mxu2 %vm203_vm0, %v797_v4 }
  0xe4   : > { %777 = vmatmul.msk.f32.gmra.mxu0 %vm203_vm0, %v767_v5 }
 0x117   : > { %v540_v8 = vpop.f32.mrf.mxu3 }
 0x119   : > { %v251_v9 = vpop.f32.mrf.mxu0 }
 0x11a   : > { %v329_v27 = vadd.f32 %v328_v6, %v251_v9 }
 0x11d   : > { %v429_v11 = vpop.f32.mrf.mxu2 }
 0x11e   : > { %v459_v31 = vadd.f32 %v429_v11, %v329_v27 }
 0x11f   : > { %v543_v12 = vpop.f32.mrf.mxu3 }
 0x120   : > { %v570_v34 = vadd.f32 %v540_v8, %v459_v31 }
 0x121   : > { %v254_v13 = vpop.f32.mrf.mxu0 }
 0x122   : > { %v332_v36 = vadd.f32 %v331_v7, %v254_v13  ;;  %v580_v40 = vmul.f32 %v570_v34, %v570_v34 }
 0x125   : > { %v432_v15 = vpop.f32.mrf.mxu2 }
 0x126   : > { %v460_v42 = vadd.f32 %v432_v15, %v332_v36 }
 0x127   : > { %v546_v16 = vpop.f32.mrf.mxu3 }
 0x128   : > { %v571_v48 = vadd.f32 %v543_v12, %v460_v42 }
 0x129   : > { %v257_v17 = vpop.f32.mrf.mxu0 }
 0x12a   : > { %v335_v47 = vadd.f32 %v334_v10, %v257_v17  ;;  %v581_v55 = vmul.f32 %v571_v48, %v571_v48 }
 0x12d   : > { %v435_v18 = vpop.f32.mrf.mxu2 }
 0x12e   : > { %v461_v53 = vadd.f32 %v435_v18, %v335_v47 }
 0x12f   : > { %v1258_v20 = vpop.f32.mrf.mxu3 }
 0x130   : > { %v572_v62 = vadd.f32 %v546_v16, %v461_v53 }
 0x131   : > { %v260_v21 = vpop.f32.mrf.mxu0 }
 0x132   : > { %v338_v0 = vadd.f32 %v337_v14, %v260_v21  ;;  %v582_v5 = vmul.f32 %v572_v62, %v572_v62 }
 0x135   : > { %v438_v22 = vpop.f32.mrf.mxu2 }
 0x136   : > { %v462_v7 = vadd.f32 %v438_v22, %v338_v0  ;;  %v355_v22 = vpop.f32.mrf.mxu1 }
 0x137   : > { %v1260_v23 = vpop.f32.mrf.mxu3 }
 0x138   : > { %v573_v17 = vadd.f32 %v1258_v20, %v462_v7 }
 0x139   : > { %v263_v25 = vpop.f32.mrf.mxu0 }
 0x13a   : > { %v341_v15 = vadd.f32 %v1256_v19, %v263_v25 }
 0x13d   : > { %v1262_v26 = vpop.f32.mrf.mxu2 }
 0x13e   : > { %v463_v31 = vadd.f32 %v1262_v26, %v341_v15 }
 0x13f   : > { %v555_v28 = vpop.f32.mrf.mxu3 }
 0x141   : > { %v266_v29 = vpop.f32.mrf.mxu0 }
 0x142   : > { %v344_v32 = vadd.f32 %v343_v24, %v266_v29 }
 0x145   : > { %v444_v33 = vpop.f32.mrf.mxu2 }
 0x146   : > { %v464_v35 = vadd.f32 %v444_v33, %v344_v32  ;;  %v583_v33 = vmul.f32 %v573_v17, %v573_v17 }
 0x147   : > { %v558_v37 = vpop.f32.mrf.mxu3 }
 0x148   : > { %v575_v38 = vadd.f32 %v555_v28, %v464_v35 }
 0x149   : > { %v269_v39 = vpop.f32.mrf.mxu0 }
 0x14a   : > { %v585_v41 = vmul.f32 %v575_v38, %v575_v38  ;;  %v347_v43 = vadd.f32 %v346_v30, %v269_v39 }
 0x14c   : > { %v590_v45 = vadd.f32 %v585_v41, %v580_v40  ;;  %v574_v40 = vadd.f32 %v1260_v23, %v463_v31 }
 0x14d   : > { %v447_v46 = vpop.f32.mrf.mxu2 }
 0x14e   : > { %924 = vrsqrt.f32 %v590_v45  ;;  %v465_v49 = vadd.f32 %v447_v46, %v347_v43  ;;  %vm602_vm4 = vcmp.eq.f32.partialorder %v590_v45, inf  ;;  %v605_v24 = vand.u32 2147483648, %v590_v45 }
 0x14f   : > { %v561_v52 = vpop.f32.mrf.mxu3  ;;  %vm604_vm5 = vcmp.eq.f32.partialorder %v590_v45, 0.0  ;;  %v584_v47 = vmul.f32 %v574_v40, %v574_v40 }
 0x150   : > { %v576_v50 = vadd.f32 %v558_v37, %v465_v49 }
 0x151   : > { %v272_v51 = vpop.f32.mrf.mxu0 }
 0x152   : > { %v350_v54 = vadd.f32 %v349_v44, %v272_v51  ;;  %v586_v56 = vmul.f32 %v576_v50, %v576_v50 }
 0x154   : > { %v925_v57 = vpop.eup %924  ;;  %v1264_v59 = vadd.f32 %v586_v56, %v581_v55 }
 0x155   : > { %v596_v58 = vmul.f32 %v925_v57, %v590_v45  ;;  %v450_v60 = vpop.f32.mrf.mxu2 }
 0x156   : > { %v466_v63 = vadd.f32 %v450_v60, %v350_v54  ;;  %926 = vrsqrt.f32 %v1264_v59  ;;  %vm614_vm6 = vcmp.eq.f32.partialorder %v1264_v59, inf  ;;  %vm616_vm7 = vcmp.eq.f32.partialorder %v1264_v59, 0.0 }
 0x157   : > { %v597_v1 = vmul.f32 %v925_v57, %v596_v58  ;;  %v564_v10 = vpop.f32.mrf.mxu3 }
 0x158   : > { %v577_v2 = vadd.f32 %v561_v52, %v466_v63 }
 0x159   : > { %v598_v3 = vmul.f32 0.5, %v597_v1  ;;  %v275_v4 = vpop.f32.mrf.mxu0 }
 0x15a   : > { %v587_v6 = vmul.f32 %v577_v2, %v577_v2  ;;  %v353_v9 = vadd.f32 %v352_v61, %v275_v4 }
 0x15b   : > { %v599_v8 = vsub.f32 1.5, %v598_v3 }
 0x15c   : > { %v1268_v11 = vadd.f32 %v587_v6, %v582_v5  ;;  %v927_v12 = vpop.eup %926 }
 0x15d   : > { %v600_v13 = vmul.f32 %v925_v57, %v599_v8  ;;  %v453_v14 = vpop.f32.mrf.mxu2  ;;  %v608_v16 = vmul.f32 %v927_v12, %v1264_v59 }
 0x15e   : > { %928 = vrsqrt.f32 %v1268_v11  ;;  %v467_v21 = vadd.f32 %v453_v14, %v353_v9  ;;  %vm626_vm8 = vcmp.eq.f32.partialorder %v1268_v11, inf  ;;  %v629_v56 = vand.u32 2147483648, %v1268_v11 }
 0x15f   : > { %v601_v18 = vmul.f32 %v600_v13, %v590_v45  ;;  %v609_v27 = vmul.f32 %v927_v12, %v608_v16  ;;  %v567_v39 = vpop.f32.mrf.mxu3  ;;  %vm628_vm9 = vcmp.eq.f32.partialorder %v1268_v11, 0.0 }
 0x160   : > { %v578_v29 = vadd.f32 %v564_v10, %v467_v21 }
 0x161   : > { %v603_v28 = vsel %vm602_vm4, %v590_v45, %v601_v18  ;;  %v278_v30 = vpop.f32.mrf.mxu0  ;;  %v610_v32 = vmul.f32 0.5, %v609_v27  ;;  %v617_v45 = vand.u32 2147483648, %v1264_v59 }
 0x162   : > { %v356_v19 = vadd.f32 %v355_v22, %v278_v30  ;;  %v606_v25 = vsel %vm604_vm5, %v605_v24, %v603_v28  ;;  %v588_v34 = vmul.f32 %v578_v29, %v578_v29 }
 0x163   : > { %655 = vst [vmem:[%s1277_s23] sm:$0xff] %v606_v25  ;;  %v611_v35 = vsub.f32 1.5, %v610_v32 }
 0x164   : > { %v929_v20 = vpop.eup %928  ;;  %v593_v37 = vadd.f32 %v588_v34, %v583_v33 }
 0x165   : > { %v620_v36 = vmul.f32 %v929_v20, %v1268_v11  ;;  %v456_v38 = vpop.f32.mrf.mxu2  ;;  %v612_v41 = vmul.f32 %v927_v12, %v611_v35 }
 0x166   : > { %v468_v26 = vadd.f32 %v456_v38, %v356_v19  ;;  %930 = vrsqrt.f32 %v593_v37  ;;  %vm638_vm10 = vcmp.eq.f32.partialorder %v593_v37, inf  ;;  %v641_v3 = vand.u32 2147483648, %v593_v37 }
 0x167   : > { %v621_v42 = vmul.f32 %v929_v20, %v620_v36  ;;  %v613_v43 = vmul.f32 %v612_v41, %v1264_v59  ;;  %vm640_vm11 = vcmp.eq.f32.partialorder %v593_v37, 0.0 }
 0x168   : > { %v579_v44 = vadd.f32 %v567_v39, %v468_v26 }
 0x169   : > { %v622_v46 = vmul.f32 0.5, %v621_v42  ;;  %v615_v48 = vsel %vm614_vm6, %v1264_v59, %v613_v43 }
 0x16a   : > { %v589_v49 = vmul.f32 %v579_v44, %v579_v44  ;;  %v618_v50 = vsel %vm616_vm7, %v617_v45, %v615_v48 }
 0x16b   : > { %v623_v23 = vsub.f32 1.5, %v622_v46  ;;  %656 = vst [vmem:[%s1277_s23 + $0x8] sm:$0xff] %v618_v50 }
 0x16c   : > { %v594_v51 = vadd.f32 %v589_v49, %v584_v47  ;;  %v931_v52 = vpop.eup %930 }
 0x16d   : > { %v624_v53 = vmul.f32 %v929_v20, %v623_v23  ;;  %v632_v54 = vmul.f32 %v931_v52, %v593_v37 }
 0x16e   : > { %932 = vrsqrt.f32 %v594_v51  ;;  %vm650_vm12 = vcmp.eq.f32.partialorder %v594_v51, inf  ;;  %v653_v10 = vand.u32 2147483648, %v594_v51  ;;  %vm652_vm13 = vcmp.eq.f32.partialorder %v594_v51, 0.0 }
 0x16f   : > { %v625_v55 = vmul.f32 %v624_v53, %v1268_v11  ;;  %v633_v57 = vmul.f32 %v931_v52, %v632_v54 }
 0x171   : > { %v627_v58 = vsel %vm626_vm8, %v1268_v11, %v625_v55  ;;  %v634_v59 = vmul.f32 0.5, %v633_v57 }
 0x172   : > { %v630_v60 = vsel %vm628_vm9, %v629_v56, %v627_v58 }
 0x173   : > { %657 = vst [vmem:[%s1277_s23 + $0x10] sm:$0xff] %v630_v60  ;;  %v635_v62 = vsub.f32 1.5, %v634_v59 }
 0x174   : > { %v933_v61 = vpop.eup %932 }
 0x175   : > { %v644_v63 = vmul.f32 %v933_v61, %v594_v51  ;;  %v636_v0 = vmul.f32 %v931_v52, %v635_v62 }
 0x177   : > { %v645_v1 = vmul.f32 %v933_v61, %v644_v63  ;;  %v637_v2 = vmul.f32 %v636_v0, %v593_v37 }
 0x179   : > { %v646_v4 = vmul.f32 0.5, %v645_v1  ;;  %v639_v5 = vsel %vm638_vm10, %v593_v37, %v637_v2 }
 0x17a   : > { %v642_v7 = vsel %vm640_vm11, %v641_v3, %v639_v5 }
 0x17b   : > { %v647_v6 = vsub.f32 1.5, %v646_v4  ;;  %658 = vst [vmem:[%s1277_s23 + $0x18] sm:$0xff] %v642_v7 }
 0x17d   : > { %v648_v8 = vmul.f32 %v933_v61, %v647_v6 }
 0x17f   : > { %v649_v9 = vmul.f32 %v648_v8, %v594_v51 }
 0x181   : > { %v651_v11 = vsel %vm650_vm12, %v594_v51, %v649_v9 }
 0x182   : > { %v654_v12 = vsel %vm652_vm13, %v653_v10, %v651_v11 }
 0x183   : > { %659 = vst [vmem:[%s1277_s23 + $0x20] sm:$0xff] %v654_v12 }
 0x184   : > { %961 = shalt.err (!%p958_p5)
}
 0x185   : > { %s1017_s15 = smov 128   ;;  %s1018_s16 = smov 8  }
 0x186   : > { %834 = dma.vmem_to_hbm [thread:$0]  (%p1074_p4), %s675_s28, 640, %s677_s12, %s661_s29, %s1017_s15, %s1017_s15, %s1018_s16  }
 0x187 PF: > { %p840_p6 = scmp.ge.s32.totalorder %s1012_s14, 2  ;;  %s691_s18 = sand.u32 1, %s992_s9  }
 0x188   : > { %s692_s20 = scalar_lea.sflag [#allocation3], %s691_s18 }
 0x189   : > { %p837_p7 = pnand %p840_p6, %p1081_p8 }
 0x18b   : > { %p838_p9 = pneg %p837_p7 }
 0x18d   : > { %987 = dma.done.wait (%p838_p9), %s692_s20, 640  }
 0x18e   : > { %989 = vsyncadd (%p838_p9), %s692_s20, 4294966656  ;;  %s15_s14 = sadd.s32 1, %s1012_s14   ;;  %s1340_s9 = smov %s996_s10 }
 0x18f   : > { %p12_p10 = scmp.ge.s32.totalorder %s15_s14, 4   ;;  %s1341_s10 = smov %s1000_s11 }
 0x190   : > { %s1342_s11 = smov %s1087_s22  ;;  %s1343_s12 = smov %s1008_s13 }
 0x191   : > { %s1344_s13 = smov %s1346_s17  ;;  %14 = sbr.rel (!%p12_p10) target bundleno = 4 (0x4), region = 67 }
 0x196   :  { %698 = vsyncpa [#allocation3], 1 }
 0x197   :  { %700 = vsyncpa [#allocation3 + $0x1], 1 }

</bundles_post_ra>
